<compile_context>
chip_gen: v7x
topology: tpu7x:2x2x1
jax: 0.10.0
libtpu: 0.0.40
codegen_flags: <defaults>
</compile_context>

<pallas_src>
import jax
import jax.numpy as jnp
import numpy as np
from jax.experimental import pallas as pl
from jax.experimental.pallas import tpu as pltpu


# ----------------------------------------------------------------------------
# Kernel: local branch (1x1 conv -> BN -> ReLU -> 1x1 conv -> BN) + global bias
# ----------------------------------------------------------------------------
def gla_local_kernel(x_ref, w1_ref, b1_ref, w2_ref, beff_ref, o_ref):
    # x_ref:    (1, C, TM)  input dtype (f32); cast to compute dtype in-kernel
    # w1_ref:   (I, C)      compute dtype
    # b1_ref:   (I, 1)      f32
    # w2_ref:   (C, I)      compute dtype
    # beff_ref: (1, C, 1)   f32  (= local 2nd bias + per-batch global branch)
    # o_ref:    (1, C, TM)  out dtype
    x = x_ref[0].astype(w1_ref.dtype)                                   # (C, TM)
    h = jnp.dot(w1_ref[...], x, preferred_element_type=jnp.float32)     # (I, TM) f32
    h = jnp.maximum(h + b1_ref[...], 0.0)                               # ReLU, f32
    loc = jnp.dot(w2_ref[...], h.astype(w2_ref.dtype),
                  preferred_element_type=jnp.float32)                   # (C, TM) f32
    o_ref[0] = (loc + beff_ref[0]).astype(o_ref.dtype)                  # + global bcast


# ----------------------------------------------------------------------------
# Tiling plan (generation-aware VMEM budget)
# ----------------------------------------------------------------------------
def _ceil_to(x, m):
    return ((x + m - 1) // m) * m


def _vmem_plan():
    """(working-set budget bytes, vmem_limit_bytes) per TPU generation."""
    try:
        cap = int(pltpu.get_tpu_info().vmem_capacity_bytes)
    except Exception:
        cap = 64 << 20  # conservative fallback (v7x per-TensorCore)
    if cap >= (96 << 20):          # v5e / v6e: 128 MiB VMEM
        return 32 << 20, 80 << 20
    return 16 << 20, 48 << 20      # v7x: 64 MiB per TC (or unknown)


def _plan_hw_tiling(hw, c, inter, n, in_itemsize, out_itemsize):
    """Pick lane tile TM (multiple of 128), padded HW, and the VMEM limit."""
    budget, vmem_limit = _vmem_plan()
    hw128 = _ceil_to(hw, 128)
    # Bytes per lane column of the per-step working set:
    #   double-buffered x tile + double-buffered out tile + f32 intermediate h.
    per_tm = 2 * c * (in_itemsize + out_itemsize) + inter * 4
    tm = min(hw128, max(128, (budget // per_tm) // 128 * 128))
    # v7x has 2 TensorCores sharded over the parallel grid axes: with a single
    # image make sure there are >= 2 grid steps so neither core sits idle.
    if n == 1 and tm >= hw128 and hw128 >= 256:
        tm = max(128, (hw128 // 2) // 128 * 128)
    hw_pad = _ceil_to(hw128, tm)
    return tm, hw_pad, vmem_limit


# ----------------------------------------------------------------------------
# Parameters (eval-mode BN folded into the 1x1 convs)
# ----------------------------------------------------------------------------
def fold_bn(w, b, gamma, beta, mean, var, eps=1e-5):
    """Fold eval-mode BN into a 1x1 conv expressed as x @ w + b, w: (in, out)."""
    s = gamma / jnp.sqrt(var + eps)
    return w * s[None, :], s * (b - mean) + beta


def make_params(key, channels, r):
    inter = int(channels // r)
    ks = jax.random.split(key, 20)

    def conv(k, cin, cout, scale=0.1):
        kw, kb = jax.random.split(k)
        w = jax.random.normal(kw, (cin, cout), jnp.float32) * scale   # x @ w
        b = jax.random.normal(kb, (cout,), jnp.float32) * scale
        return w, b

    def bn(k, c):
        k1, k2, k3, k4 = jax.random.split(k, 4)
        gamma = 1.0 + 0.1 * jax.random.normal(k1, (c,), jnp.float32)
        beta = 0.1 * jax.random.normal(k2, (c,), jnp.float32)
        mean = 0.1 * jax.random.normal(k3, (c,), jnp.float32)
        var = 1.0 + 0.1 * jax.random.uniform(k4, (c,), jnp.float32)
        return gamma, beta, mean, var

    params = {}
    for name, kidx in (("local", 0), ("global", 10)):
        w1, b1 = conv(ks[kidx + 0], channels, inter)
        w2, b2 = conv(ks[kidx + 1], inter, channels)
        bn1 = bn(ks[kidx + 2], inter)
        bn2 = bn(ks[kidx + 3], channels)
        w1f, b1f = fold_bn(w1, b1, *bn1)
        w2f, b2f = fold_bn(w2, b2, *bn2)
        params[name] = (w1f, b1f.reshape(1, -1), w2f, b2f.reshape(1, -1))
    return params


# ----------------------------------------------------------------------------
# Wrapper
# ----------------------------------------------------------------------------
def global_local_attention(x_nchw, params, compute_dtype=None, out_dtype=None):
    N, C, H, W = x_nchw.shape
    HW = H * W
    w1l, b1l, w2l, b2l = params["local"]     # (C,I), (1,I), (I,C), (1,C)
    w1g, b1g, w2g, b2g = params["global"]
    I = w1l.shape[1]

    if compute_dtype is None:
        # bf16 packs 16 rows per sublane group; for C < 16 there is no
        # bandwidth win left (x is read in its native dtype) -> stay f32.
        compute_dtype = jnp.float32 if C < 16 else jnp.bfloat16
    if out_dtype is None:
        out_dtype = compute_dtype

    # NCHW -> (N, C, HW): pure reshape, no transpose, no dtype copy in HBM.
    x3 = x_nchw.reshape(N, C, HW)

    # ---- global branch (AdaptiveAvgPool2d(1) -> MLP): tiny, plain JAX, f32 ----
    pooled = jnp.mean(x3.astype(jnp.float32), axis=2)                   # (N, C)
    hg = jnp.maximum(pooled @ w1g + b1g, 0.0)                           # (N, I)
    g = hg @ w2g + b2g                                                  # (N, C)
    beff = (g + b2l).reshape(N, C, 1).astype(jnp.float32)               # fold into local bias

    # ---- local branch: Pallas kernel, tiled over HW ----
    in_itemsize = jnp.dtype(x3.dtype).itemsize
    out_itemsize = jnp.dtype(out_dtype).itemsize
    TM, HW_pad, vmem_limit = _plan_hw_tiling(HW, C, I, N, in_itemsize, out_itemsize)
    if HW_pad != HW:
        # Pad to a lane-dense multiple of the tile; pad is sliced off below.
        x3 = jnp.pad(x3, ((0, 0), (0, 0), (0, HW_pad - HW)))

    w1k = w1l.T.astype(compute_dtype)                                   # (I, C)
    b1k = b1l.reshape(-1, 1).astype(jnp.float32)                        # (I, 1)
    w2k = w2l.T.astype(compute_dtype)                                   # (C, I)

    grid = (N, HW_pad // TM)

    cost = pl.CostEstimate(
        flops=4 * N * HW_pad * C * I,
        transcendentals=0,
        bytes_accessed=(N * C * HW_pad * (in_itemsize + out_itemsize)
                        + 2 * I * C * jnp.dtype(compute_dtype).itemsize
                        + N * C * 4 + I * 4),
    )

    out = pl.pallas_call(
        gla_local_kernel,
        out_shape=jax.ShapeDtypeStruct((N, C, HW_pad), out_dtype),
        grid_spec=pltpu.PrefetchScalarGridSpec(
            num_scalar_prefetch=0,
            grid=grid,
            in_specs=[
                pl.BlockSpec((1, C, TM), lambda n, m: (n, 0, m)),   # x tile
                pl.BlockSpec((I, C), lambda n, m: (0, 0)),          # w1^T
                pl.BlockSpec((I, 1), lambda n, m: (0, 0)),          # b1
                pl.BlockSpec((C, I), lambda n, m: (0, 0)),          # w2^T
                pl.BlockSpec((1, C, 1), lambda n, m: (n, 0, 0)),    # b2 + global(n)
            ],
            out_specs=pl.BlockSpec((1, C, TM), lambda n, m: (n, 0, m)),
        ),
        compiler_params=pltpu.CompilerParams(
            dimension_semantics=("parallel", "parallel"),
            vmem_limit_bytes=vmem_limit,
        ),
        cost_estimate=cost,
    )(x3, w1k, b1k, w2k, beff)

    if HW_pad != HW:
        out = out[:, :, :HW]
    return out.reshape(N, C, H, W)


# ----------------------------------------------------------------------------
# Plain-JAX reference of the same (folded-BN) computation, f32
# ----------------------------------------------------------------------------
def reference(x_nchw, params):
    N, C, H, W = x_nchw.shape
    x = jnp.transpose(x_nchw, (0, 2, 3, 1)).reshape(N, H * W, C).astype(jnp.float32)
    w1l, b1l, w2l, b2l = params["local"]
    w1g, b1g, w2g, b2g = params["global"]

    local = jnp.maximum(x @ w1l + b1l, 0.0) @ w2l + b2l                 # (N, HW, C)
    pooled = jnp.mean(x, axis=1, keepdims=True)                         # (N, 1, C)
    glob = jnp.maximum(pooled @ w1g + b1g, 0.0) @ w2g + b2g             # (N, 1, C)
    out = local + glob
    return out.reshape(N, H, W, C).transpose(0, 3, 1, 2)


if __name__ == "__main__":
    key = jax.random.PRNGKey(0)
    k_x, k_p, k_x2, k_x3 = jax.random.split(key, 4)

    N, C, H, W = 2, 8, 16, 16
    r = 2
    x = jax.random.normal(k_x, (N, C, H, W), jnp.float32)
    params = make_params(k_p, C, r)
    ref = np.asarray(reference(x, params))

    # 1) f32 compute / f32 out: strict match against the plain-JAX reference.
    out_f32 = jax.block_until_ready(
        global_local_attention(x, params, compute_dtype=jnp.float32,
                               out_dtype=jnp.float32))
    np.testing.assert_allclose(np.asarray(out_f32), ref, rtol=1e-5, atol=1e-5)

    # 2) bf16 matmul inputs + bf16 output (MXU-friendly path): loose tolerance.
    out_bf16 = jax.block_until_ready(
        global_local_attention(x, params, compute_dtype=jnp.bfloat16,
                               out_dtype=jnp.bfloat16))
    np.testing.assert_allclose(np.asarray(out_bf16).astype(np.float32), ref,
                               rtol=5e-2, atol=5e-2)

    # 3) auto dtype selection (C=8 < 16 -> f32): strict match.
    out_auto = jax.block_until_ready(global_local_attention(x, params))
    np.testing.assert_allclose(np.asarray(out_auto), ref, rtol=1e-5, atol=1e-5)

    # 4) N=1 (grid split so both v7x cores get work) and non-128-aligned HW
    #    (padding path), f32 strict.
    x1 = jax.random.normal(k_x2, (1, C, 16, 16), jnp.float32)
    ref1 = np.asarray(reference(x1, params))
    out1 = jax.block_until_ready(
        global_local_attention(x1, params, compute_dtype=jnp.float32,
                               out_dtype=jnp.float32))
    np.testing.assert_allclose(np.asarray(out1), ref1, rtol=1e-5, atol=1e-5)

    x2 = jax.random.normal(k_x3, (1, C, 10, 10), jnp.float32)
    ref2 = np.asarray(reference(x2, params))
    out2 = jax.block_until_ready(
        global_local_attention(x2, params, compute_dtype=jnp.float32,
                               out_dtype=jnp.float32))
    np.testing.assert_allclose(np.asarray(out2), ref2, rtol=1e-5, atol=1e-5)

    print("KERNEL_OK")
</pallas_src>

<mosaic_0001>
module attributes {stable_mosaic.version = 11 : i64} {
  func.func @gla_local_kernel(%arg0: i32, %arg1: i32, %arg2: memref<1x8x256xf32, #tpu.memory_space<vmem>>, %arg3: memref<4x8xf32, #tpu.memory_space<vmem>>, %arg4: memref<4x1xf32, #tpu.memory_space<vmem>>, %arg5: memref<8x4xf32, #tpu.memory_space<vmem>>, %arg6: memref<1x8x1xf32, #tpu.memory_space<vmem>>, %arg7: memref<1x8x256xf32, #tpu.memory_space<vmem>>) attributes {dimension_semantics = [#tpu.dimension_semantics<parallel>, #tpu.dimension_semantics<parallel>], iteration_bounds = array<i64: 2, 1>, scalar_prefetch = 0 : i64, scratch_operands = 0 : i64, tpu.core_type = #tpu.core_type<tc>, window_params = [{transform_indices = @transform_0, window_bounds = array<i64: 1, 8, 256>}, {pipeline_mode = #tpu.pipeline_mode<synchronous>, transform_indices = @transform_1, window_bounds = array<i64: 4, 8>}, {pipeline_mode = #tpu.pipeline_mode<synchronous>, transform_indices = @transform_2, window_bounds = array<i64: 4, 1>}, {pipeline_mode = #tpu.pipeline_mode<synchronous>, transform_indices = @transform_3, window_bounds = array<i64: 8, 4>}, {transform_indices = @transform_4, window_bounds = array<i64: 1, 8, 1>}, {transform_indices = @transform_5, window_bounds = array<i64: 1, 8, 256>}]} {
    %c0 = arith.constant 0 : index
    %c0_0 = arith.constant 0 : index
    %c0_1 = arith.constant 0 : index
    %0 = vector.load %arg2[%c0, %c0_0, %c0_1] : memref<1x8x256xf32, #tpu.memory_space<vmem>>, vector<1x8x256xf32>
    %1 = vector.shape_cast %0 : vector<1x8x256xf32> to vector<8x256xf32>
    %c0_2 = arith.constant 0 : index
    %c0_3 = arith.constant 0 : index
    %2 = vector.load %arg3[%c0_2, %c0_3] : memref<4x8xf32, #tpu.memory_space<vmem>>, vector<4x8xf32>
    %cst = arith.constant dense<0.000000e+00> : vector<4x256xf32>
    %3 = tpu.matmul %2, %1, %cst {dimension_numbers = #tpu.dot_dimension_numbers<[1], [0], [0], [1], [0, 0, 1, 1], [], []>} : vector<4x8xf32>, vector<8x256xf32>, vector<4x256xf32> -> vector<4x256xf32>
    %c0_4 = arith.constant 0 : index
    %c0_5 = arith.constant 0 : index
    %4 = vector.load %arg4[%c0_4, %c0_5] : memref<4x1xf32, #tpu.memory_space<vmem>>, vector<4x1xf32>
    %5 = vector.broadcast %4 : vector<4x1xf32> to vector<4x256xf32>
    %6 = arith.addf %3, %5 : vector<4x256xf32>
    %cst_6 = arith.constant 0.000000e+00 : f32
    %7 = vector.broadcast %cst_6 : f32 to vector<4x256xf32>
    %8 = arith.maximumf %6, %7 : vector<4x256xf32>
    %c0_7 = arith.constant 0 : index
    %c0_8 = arith.constant 0 : index
    %9 = vector.load %arg5[%c0_7, %c0_8] : memref<8x4xf32, #tpu.memory_space<vmem>>, vector<8x4xf32>
    %cst_9 = arith.constant dense<0.000000e+00> : vector<8x256xf32>
    %10 = tpu.matmul %9, %8, %cst_9 {dimension_numbers = #tpu.dot_dimension_numbers<[1], [0], [0], [1], [0, 0, 1, 1], [], []>} : vector<8x4xf32>, vector<4x256xf32>, vector<8x256xf32> -> vector<8x256xf32>
    %c0_10 = arith.constant 0 : index
    %c0_11 = arith.constant 0 : index
    %c0_12 = arith.constant 0 : index
    %11 = vector.load %arg6[%c0_10, %c0_11, %c0_12] : memref<1x8x1xf32, #tpu.memory_space<vmem>>, vector<1x8x1xf32>
    %12 = vector.shape_cast %11 : vector<1x8x1xf32> to vector<8x1xf32>
    %13 = vector.broadcast %12 : vector<8x1xf32> to vector<8x256xf32>
    %14 = arith.addf %10, %13 : vector<8x256xf32>
    %c0_13 = arith.constant 0 : index
    %c0_14 = arith.constant 0 : index
    %c0_15 = arith.constant 0 : index
    %15 = vector.load %arg7[%c0_13, %c0_14, %c0_15] : memref<1x8x256xf32, #tpu.memory_space<vmem>>, vector<1x8x256xf32>
    %16 = vector.shape_cast %15 : vector<1x8x256xf32> to vector<8x256xf32>
    %17 = vector.shape_cast %14 : vector<8x256xf32> to vector<1x8x256xf32>
    tpu.vector_store %arg7[%c0_13, %c0_14, %c0_15], %17 {strides = array<i32>} : memref<1x8x256xf32, #tpu.memory_space<vmem>>, vector<1x8x256xf32>,
    return
  }
  func.func @transform_0(%arg0: i32, %arg1: i32) -> (i32, i32, i32) {
    %c0_i32 = arith.constant 0 : i32
    %c0_i32_0 = arith.constant 0 : i32
    return %arg0, %c0_i32, %arg1 : i32, i32, i32
  }
  func.func @transform_1(%arg0: i32, %arg1: i32) -> (i32, i32) {
    %c0_i32 = arith.constant 0 : i32
    %c0_i32_0 = arith.constant 0 : i32
    %c0_i32_1 = arith.constant 0 : i32
    return %c0_i32, %c0_i32_0 : i32, i32
  }
  func.func @transform_2(%arg0: i32, %arg1: i32) -> (i32, i32) {
    %c0_i32 = arith.constant 0 : i32
    %c0_i32_0 = arith.constant 0 : i32
    %c0_i32_1 = arith.constant 0 : i32
    return %c0_i32, %c0_i32_0 : i32, i32
  }
  func.func @transform_3(%arg0: i32, %arg1: i32) -> (i32, i32) {
    %c0_i32 = arith.constant 0 : i32
    %c0_i32_0 = arith.constant 0 : i32
    %c0_i32_1 = arith.constant 0 : i32
    return %c0_i32, %c0_i32_0 : i32, i32
  }
  func.func @transform_4(%arg0: i32, %arg1: i32) -> (i32, i32, i32) {
    %c0_i32 = arith.constant 0 : i32
    %c0_i32_0 = arith.constant 0 : i32
    %c0_i32_1 = arith.constant 0 : i32
    return %arg0, %c0_i32, %c0_i32_0 : i32, i32, i32
  }
  func.func @transform_5(%arg0: i32, %arg1: i32) -> (i32, i32, i32) {
    %c0_i32 = arith.constant 0 : i32
    %c0_i32_0 = arith.constant 0 : i32
    return %arg0, %c0_i32, %arg1 : i32, i32, i32
  }
}

</mosaic_0001>

<bundles_post_ra>
// kernel: tpu_custom_call.1
= control target key start
LH: loop header
LB: loop body
LE: loop exit
PB: predicated region body
PF: predicated region fallthrough
CT: control target
= control target key end

     0   :  { %10 = vsyncpa [#allocation3], 0  ;;  %s974_s0 = inlined_call_operand.vmem [shape: f32[2,8,256], index: 0, kind: input, shape index: {}]   ;;  %s975_s1 = inlined_call_operand.hbm [shape: f32[4,8], index: 1, kind: input, shape index: {}]   ;;  %s976_s2 = inlined_call_operand.vmem [shape: f32[4,1], index: 2, kind: input, shape index: {}]   ;;  %s977_s3 = inlined_call_operand.vmem [shape: f32[8,4], index: 3, kind: input, shape index: {}]   ;;  %s978_s4 = inlined_call_operand.vmem [shape: f32[2,8,1], index: 4, kind: input, shape index: {}]   ;;  %s979_s5 = inlined_call_operand.hbm [shape: f32[2,8,256], index: 5, kind: output, shape index: {}]  }
   0x1   :  { %11 = vsyncpa [#allocation4], 0 }
   0x2   :  { %13 = vsyncpa [#allocation4 + $0x1], 0  ;;  %s815_s18 = smov 0   ;;  %s817_s19 = smov 0  }
   0x3   :  { %s819_s20 = smov 0   ;;  %s821_s21 = smov 0  }
   0x4   :  { %s823_s22 = smov 0   ;;  %s825_s23 = smov 0  }
   0x5 LB: > { %s578_s24 = sadd.s32 4294967295, %s779_s23   ;;  %s579_s25 = sadd.s32 4294967294, %s779_s23   ;;  %s779_s23 = sphi %s825_s23, %s19_s23   ;;  %s775_s22 = sphi %s823_s22, %s997_s22   ;;  %s771_s21 = sphi %s821_s21, %s996_s21   ;;  %s767_s20 = sphi %s819_s20, %s995_s20   ;;  %s763_s19 = sphi %s817_s19, %s994_s19   ;;  %s759_s18 = sphi %s815_s18, %s993_s18  }
   0x6   : > { %s31_s26 = sadd.s32 1, %s775_s22  ;;  %s157_s27 = sadd.s32 1, %s767_s20 }
   0x7   : > { %p33_p0 = scmp.ge.s32.totalorder %s31_s26, 2  ;;  %p167_p1 = scmp.ne.s32.totalorder %s767_s20, %s763_s19 }
   0x8   : > { %p168_p2 = scmp.eq.s32.totalorder %s578_s24, 1  ;;  %p173_p3 = scmp.ne.s32.totalorder %s763_s19, %s759_s18 }
   0x9   : > { %s999_s26 = smov (%p33_p0, %s31_s26), 0  ;;  %p174_p5 = scmp.eq.s32.totalorder %s579_s25, 1 }
   0xa   : > { %p855_p4 = por %p168_p2, %p167_p1  ;;  %s152_s29 = ssub.s32 %s775_s22, %s999_s26 }
   0xb   : > { %p580_p6 = scmp.ge.s32.totalorder %s779_s23, 1  ;;  %p155_p7 = scmp.eq.s32.totalorder %s152_s29, 0 }
   0xc   : > { %s984_s28 = scalar_select %p855_p4, 1, 0 }
   0xd   : > { %p862_p8 = por %p174_p5, %p173_p3  ;;  %p181_p9 = scmp.lt.s32.totalorder %s779_s23, 3 }
   0xe   : > { %s868_s6 = scalar_select %p155_p7, %s767_s20, %s157_s27  }
   0xf   : > { %s985_s30 = scalar_select %p862_p8, 1, 0 }
  0x10   : > { %p870_p10 = pnand %p580_p6, %p181_p9  ;;  %p874_p11 = scmp.eq.s32.totalorder %s578_s24, 0 }
  0x11   : > { %s781_s9 = smov [#allocation2]   ;;  %s669_s14 = scalar_lea.hbm %s975_s1, 64 }
  0x12   : > { %s986_s7 = scalar_select %p870_p10, 1, 0 }
  0x13   : > { %s987_s8 = scalar_select %p874_p11, 1, 0 }
  0x14   : > { %p606_p12 = pneg %p870_p10  ;;  %s194_s10 = sshll.u32 %s781_s9, 4  ;;  %s195_s10 = int_to_ptr.vmem [resolvable:$true] %s194_s10 }
  0x15   : > { %p670_p0 = scmp.ne.s32.totalorder %s975_s1, %s669_s14  ;;  %p676_p5 = scmp.lt.u32.totalorder %s669_s14, %s975_s1 }
  0x16   : > { %p882_p13 = pnand %p874_p11, %p606_p12 }
  0x18   : > { %p671_p1 = pneg %p882_p13 }
  0x1a   : > { %p672_p2 = pnand %p671_p1, %p670_p0 }
  0x1c   : > { %p673_p3 = pneg %p672_p2 }
  0x1e   : > { %p678_p6 = pnand %p676_p5, %p673_p3 }
  0x20   : > { %681 = shalt.err (!%p678_p6)
}
  0x21   : > { %s682_s25 = scalar_lea.vmem %s195_s10, 64  ;;  %p690_p8 = scmp.lt.s32.totalorder %s195_s10, %s195_s10 }
  0x22   : > { %p683_p7 = scmp.ne.s32.totalorder %s195_s10, %s682_s25  ;;  %p691_p4 = scmp.lt.s32.totalorder %s682_s25, %s682_s25 }
  0x24   : > { %p685_p9 = pnand %p683_p7, %p671_p1  ;;  %p692_p11 = por %p691_p4, %p690_p8 }
  0x26   : > { %p686_p12 = pneg %p685_p9 }
  0x28   : > { %p693_p10 = pnand %p692_p11, %p686_p12 }
  0x2a   : > { %696 = shalt.err (!%p693_p10)
}
  0x2b   : > { %609 = dma.hbm_to_vmem [thread:$0]  (!%p882_p13), %s975_s1, 64, %s195_s10, [#allocation3]  }
  0x2c   : > { %p989_p0 = scmp.ne.s32.totalorder %s986_s7, 0 }
  0x2d   : > { %p990_p2 = scmp.ne.s32.totalorder (!%p989_p0), %s987_s8, 0 }
  0x2e   : > { %233 = sbr.rel (%p989_p0) target bundleno = 511 (0x1ff), region = 40 }
  0x35   : > { %750 = dma.done.wait (%p990_p2), [#allocation3], 64  }
  0x36   : > { %752 = vsyncadd (%p990_p2), [#allocation3], 4294967232  ;;  %p270_p4 = scmp.lt.s32.totalorder %s771_s21, 1  ;;  %v782_v0 = vmov 0.0   ;;  %v783_v1 = vmov 0   ;;  %vm293_vm0 = vcmask 64512  }
  0x37   : > { %361 = vmatprep.mubr.f32.mxu0 %v782_v0  ;;  %668 = vset.pattern.permute.xlu0 %v783_v1  ;;  %v286_v4 = vld [vmem:[#allocation2] sm:$0xf]  ;;  %vm381_vm1 = vcmask 1043456   ;;  %vm377_vm2 = vcmask 31744   ;;  %s266_s27 = sand.u32 1, %s763_s19   ;;  %p991_p10 = scmp.ne.s32.totalorder %s984_s28, 0 }
  0x38   : > { %s271_s9 = scalar_select %p270_p4, %s771_s21, 1  ;;  %452 = vmatprep.mubr.f32.mxu1 %v782_v0  ;;  %v287_v5 = vld [vmem:[%s976_s2] sm:$0xf] }
  0x39   : > { %290 = vperm.xlu0 %668, %v287_v5   ;;  %v370_v14 = vld [vmem:[%s977_s3] sm:$0xff]  ;;  %s585_s29 = sshll.u32 %s266_s27, 4  ;;  %s784_s14 = smov [#allocation5]  }
  0x3a   : > { %s598_s11 = sshll.u32 %s271_s9, 4  ;;  %s588_s10 = sshll.u32 %s271_s9, 3 }
  0x3b   : > { %s277_s13 = scalar_lea.vmem %s974_s0, %s598_s11  ;;  %s282_s15 = scalar_lea.vmem %s978_s4, %s588_s10 }
  0x3c   : > { %v285_v2 = vld [vmem:[%s277_s13 + $0x8] sm:$0xff]  ;;  %v284_v3 = vld [vmem:[%s277_s13] sm:$0xff]  ;;  %s599_s9 = sshll.u32 %s771_s21, 8  ;;  %s268_s11 = scalar_lea.vmem [#allocation5], %s585_s29 }
  0x3d   : > { %297 = vmatprep.subr.mxu0 %v285_v2  ;;  %v371_v6 = vld [vmem:[%s282_s15] sm:$0xff]  ;;  %s478_s10 = sshll.u32 %s268_s11, 4  ;;  %s927_s13 = scalar_lea.hbm %s979_s5, %s599_s9  ;;  %s929_s10 = int_to_ptr.vmem [resolvable:$true] %s478_s10 }
  0x3e   : > { %298 = vmatpush1.msra.mxu0 %v284_v3  ;;  %374 = vperm.xlu0 %668, %v371_v6   ;;  %s462_s21 = scalar_lea.sflag [#allocation4], %s266_s27  ;;  %s697_s8 = scalar_lea.vmem %s929_s10, 256 }
  0x3f   : > { %589 = vmatmul.mubr.msk.f32.vlgmr.msra.gmra.mrb[0].mxu0 %vm293_vm0, %v286_v4  ;;  %p698_p8 = scmp.ne.s32.totalorder %s929_s10, %s697_s8  ;;  %s701_s15 = sshll.u32 %s784_s14, 4  ;;  %s702_s15 = int_to_ptr.vmem [resolvable:$false] %s701_s15 }
  0x40   : > { %s703_s16 = scalar_lea.vmem %s702_s15, 512  ;;  %p704_p1 = scmp.lt.s32.totalorder %s929_s10, %s702_s15 }
  0x41   : > { %p699_p11 = pnand %p698_p8, %p991_p10  ;;  %p705_p3 = scmp.lt.s32.totalorder %s703_s16, %s697_s8 }
  0x43   : > { %p700_p13 = pneg %p699_p11  ;;  %p706_p5 = por %p705_p3, %p704_p1 }
  0x45   : > { %p707_p6 = pnand %p706_p5, %p700_p13 }
  0xb8   : > { %v291_v7 = vpop.permute.xlu0 %290 }
  0xbd   : > { %v375_v15 = vpop.permute.xlu0 %374 }
 0x112   : > { %v363_v8 = vpop.f32.mrb[0].mxu0 }
 0x113   : > { %v364_v9 = vadd.f32 %v363_v8, %v291_v7  ;;  %v365_v10 = vpop.f32.mrb[1].mxu0 }
 0x114   : > { %v366_v11 = vadd.f32 %v365_v10, %v291_v7 }
 0x115   : > { %v368_v13 = vmax.f32 %v364_v9, 0.0 }
 0x116   : > { %v369_v12 = vmax.f32 %v366_v11, 0.0 }
 0x118   : > { %590 = vmatprep.subr.msk.mxu1 %vm381_vm1, %v369_v12 }
 0x119   : > { %591 = vmatpush1.msk.msra.mxu1 %vm381_vm1, %v368_v13 }
 0x11a   : > { %592 = vmatmul.mubr.msk.f32.vlgmr.msra.gmra.mrb[0].mxu1 %vm377_vm2, %v370_v14 }
 0x1ed   : > { %v454_v16 = vpop.f32.mrb[0].mxu1 }
 0x1ee   : > { %v455_v17 = vadd.f32 %v454_v16, %v375_v15  ;;  %v456_v18 = vpop.f32.mrb[1].mxu1 }
 0x1ef   : > { %v457_v19 = vadd.f32 %v456_v18, %v375_v15 }
 0x1f0   : > { %459 = vst [vmem:[%s268_s11] sm:$0xff] %v455_v17 }
 0x1f1   : > { %460 = vst [vmem:[%s268_s11 + $0x8] sm:$0xff] %v457_v19 }
 0x1f2   : > { %710 = shalt.err (!%p707_p6)
}
 0x1f3   : > { %s711_s17 = scalar_lea.hbm %s927_s13, 256  ;;  %s715_s27 = scalar_lea.hbm %s979_s5, 512 }
 0x1f4   : > { %p712_p7 = scmp.ne.s32.totalorder %s927_s13, %s711_s17  ;;  %p716_p0 = scmp.lt.u32.totalorder %s927_s13, %s979_s5 }
 0x1f5   : > { %p717_p2 = scmp.lt.u32.totalorder %s715_s27, %s711_s17  ;;  %p719_p8 = scmp.lt.u32.totalorder %s711_s17, %s927_s13 }
 0x1f6   : > { %p713_p9 = pnand %p712_p7, %p991_p10 }
 0x1f7   : > { %p718_p4 = por %p717_p2, %p716_p0 }
 0x1f8   : > { %p714_p12 = pneg %p713_p9 }
 0x1f9   : > { %p720_p11 = por %p719_p8, %p718_p4 }
 0x1fb   : > { %p721_p13 = pnand %p720_p11, %p714_p12 }
 0x1fd   : > { %724 = shalt.err (!%p721_p13)
}
 0x1fe   : > { %604 = dma.vmem_to_hbm [thread:$0]  (%p991_p10), %s929_s10, 256, %s927_s13, %s462_s21  }
 0x1ff PF: > { %p616_p1 = scmp.ge.s32.totalorder %s779_s23, 2  ;;  %s490_s11 = sand.u32 1, %s759_s18  }
 0x200   : > { %p992_p3 = scmp.ne.s32.totalorder %s985_s30, 0  ;;  %s491_s12 = scalar_lea.sflag [#allocation4], %s490_s11 }
 0x202   : > { %p611_p5 = pnand %p616_p1, %p992_p3 }
 0x204   : > { %754 = dma.done.wait (!%p611_p5), %s491_s12, 256  }
 0x205   : > { %756 = vsyncadd (!%p611_p5), %s491_s12, 4294967040  ;;  %s19_s23 = sadd.s32 1, %s779_s23   ;;  %s993_s18 = smov %s763_s19 }
 0x206   : > { %p16_p6 = scmp.ge.s32.totalorder %s19_s23, 4   ;;  %s994_s19 = smov %s767_s20 }
 0x207   : > { %s995_s20 = smov %s868_s6  ;;  %s996_s21 = smov %s775_s22 }
 0x208   : > { %s997_s22 = smov %s999_s26  ;;  %18 = sbr.rel (!%p16_p6) target bundleno = 5 (0x5), region = 83 }
 0x20f   :  { %496 = vsyncpa [#allocation3], 1 }
 0x210   :  { %498 = vsyncpa [#allocation3 + $0x1], 1 }
 0x211   :  { %499 = vsyncpa [#allocation4], 1 }
 0x212   :  { %501 = vsyncpa [#allocation4 + $0x1], 1 }

</bundles_post_ra>
